<compile_context>
chip_gen: v7x
topology: tpu7x:2x2x1
jax: 0.10.0
libtpu: 0.0.40
codegen_flags: <defaults>
</compile_context>

<pallas_src>
import functools

import jax
import jax.numpy as jnp
from jax import lax
from jax.experimental import pallas as pl
from jax.experimental.pallas import tpu as pltpu

_MIB = 1024 * 1024


def _moe_allreduce_kernel(num_exp_ref,    # SMEM scalar prefetch: (1,) int32
                          scale_ref,      # (E, tt, 1)  hoisted per-token expert scales
                          active_ref,     # (1, tt, H)  expert-e token input
                          token_ref,      # (tt, H)     shared expert output
                          resid_ref,      # (tt, H)
                          nw_ref,         # (1, H)
                          hid_out_ref,    # (tt, H)
                          res_out_ref,    # (tt, H)
                          acc_ref,        # (tt, H) f32 VMEM scratch accumulator
                          *, eps: float):
    e = pl.program_id(1)
    n_active = num_exp_ref[0]

    # Initialize the accumulator with token_input + residual; experts add on top.
    @pl.when(e == 0)
    def _init():
        acc_ref[...] = (token_ref[...].astype(jnp.float32)
                        + resid_ref[...].astype(jnp.float32))

    # Accumulate only active experts. Inactive experts skip both the compute
    # (this gate) and the HBM read (clamped index_map -> resident block).
    @pl.when(e < n_active)
    def _accumulate():
        scale = scale_ref[e].astype(jnp.float32)                  # (tt, 1)
        acc_ref[...] += active_ref[0].astype(jnp.float32) * scale

    # Finalize: (identity AR) + RMS norm, single lane-dense writeback per tile.
    @pl.when(e == pl.num_programs(1) - 1)
    def _finalize():
        output_residual = acc_ref[...]                            # f32 (tt, H)
        var = jnp.mean(output_residual * output_residual, axis=-1, keepdims=True)
        inv_rms = lax.rsqrt(var + eps)
        hidden = output_residual * inv_rms * nw_ref[...].astype(jnp.float32)
        hid_out_ref[...] = hidden.astype(hid_out_ref.dtype)
        res_out_ref[...] = output_residual.astype(res_out_ref.dtype)


def _ceil_to(x, m):
    return (x + m - 1) // m * m


def _vmem_capacity_bytes():
    try:
        return int(pltpu.get_tpu_info().vmem_capacity_bytes)
    except Exception:
        return 64 * _MIB   # conservative (v7x-sized) fallback


def _vmem_bytes_estimate(tt, H, E, isz, active_buffers):
    """Rough VMEM footprint of the pipelined working set (bytes)."""
    tt_p = _ceil_to(tt, 8)
    h_p = _ceil_to(H, 128)
    slab = tt_p * h_p
    total = active_buffers * slab * isz["active"]        # per-expert active stream
    total += 2 * E * tt_p * 128 * isz["scale"]           # hoisted (E,tt,1), lane-padded
    total += 2 * slab * isz["token"]                     # token_input
    total += 2 * slab * isz["resid"]                     # residual
    total += 2 * 8 * h_p * isz["nw"]                     # norm weight (1, H)
    total += 2 * 2 * slab * isz["out"]                   # two (tt, H) outputs
    total += slab * 4                                    # f32 accumulator scratch
    total += 4 * _MIB                                    # Mosaic internal scratch headroom
    return total


def _select_token_tile(T, H, E, isz, budget, tt_max, sublane_min,
                       prefer_core_split, active_buffers):
    cands = set()
    if T <= tt_max:
        cands.add(T)
    d = sublane_min
    while d <= min(T, tt_max):
        if T % d == 0:
            cands.add(d)
        d += sublane_min
    if not cands:
        return T          # ragged fallback: single full-extent token block
    cands = sorted(cands, reverse=True)

    def fits(c):
        return _vmem_bytes_estimate(c, H, E, isz, active_buffers) <= budget

    fitting = [c for c in cands if fits(c)]
    if not fitting:
        return cands[-1]  # smallest legal tile; caller raises the VMEM limit
    if prefer_core_split:
        split = [c for c in fitting if T // c >= 2]
        if split:
            return split[0]
    return fitting[0]


def moe_allreduce(residual, norm_weight, device_num_experts, scale_input,
                  active_experts_token_input, token_input, eps, *,
                  token_tile=None, vmem_limit_bytes=None, active_buffers=None):
    """residual: [T,H], norm_weight: [H], device_num_experts: scalar int,
    scale_input: [E,T], active_experts_token_input: [E,T,H], token_input: [T,H].

    Returns (hidden_states [T,H], output_residual [T,H]).
    """
    E, T, H = active_experts_token_input.shape
    assert residual.shape == (T, H)
    assert token_input.shape == (T, H)
    assert scale_input.shape == (E, T)
    assert norm_weight.shape == (H,)
    # Lane-dense outputs: non-128-multiple H would turn the two (tt, H)
    # writebacks into masked partial stores (measured up to ~4.5x slower).
    assert H % 128 == 0, f"H={H} must be a multiple of 128 (lane-dense stores)"

    out_dtype = residual.dtype
    isz = {
        "active": jnp.dtype(active_experts_token_input.dtype).itemsize,
        "token": jnp.dtype(token_input.dtype).itemsize,
        "resid": jnp.dtype(residual.dtype).itemsize,
        "scale": jnp.dtype(scale_input.dtype).itemsize,
        "nw": jnp.dtype(norm_weight.dtype).itemsize,
        "out": jnp.dtype(out_dtype).itemsize,
    }
    min_itemsize = min(isz["active"], isz["token"], isz["resid"], isz["nw"])
    sublane_min = max(8, 32 // int(min_itemsize))
    n_buf = 2 if active_buffers is None else int(active_buffers)

    # Generation-aware VMEM budget & token-tile selection: biggest lever for
    # this pure HBM-roofline kernel.
    vmem_cap = _vmem_capacity_bytes()
    budget = max(min(int(vmem_cap * 0.80), vmem_cap - 12 * _MIB), 16 * _MIB)
    if vmem_cap >= 96 * _MIB:            # v5e / v6e: 128 MiB physical VMEM, 1 TC
        tt_max = 1024 if H <= 2048 else 512
        prefer_core_split = False
    else:                                # v7x: 64 MiB VMEM, 2 TensorCores
        tt_max = 256
        prefer_core_split = True         # keep >= 2 token tiles for megacore

    if token_tile is None:
        tt = _select_token_tile(T, H, E, isz, budget, tt_max, sublane_min,
                                prefer_core_split, n_buf)
    else:
        tt = min(int(token_tile), T)

    assert T % tt == 0, f"T={T} must be divisible by token_tile={tt}"
    assert tt == T or tt % sublane_min == 0, (
        f"token_tile={tt} must be a multiple of {sublane_min} for "
        f"{min_itemsize}-byte inputs")

    est = _vmem_bytes_estimate(tt, H, E, isz, n_buf)
    if vmem_limit_bytes is None and est > 16 * _MIB:
        hard_cap = vmem_cap - 8 * _MIB
        vmem_limit_bytes = max(min(int(est * 1.25) + 4 * _MIB, hard_cap), 16 * _MIB)

    scale3 = scale_input.reshape(E, T, 1)
    nw2 = norm_weight.reshape(1, H)
    n_exp = jnp.asarray(device_num_experts, dtype=jnp.int32).reshape(1)

    kernel = functools.partial(_moe_allreduce_kernel, eps=float(eps))

    def _clamped_e(e, ne):
        # Repeat the last active expert's (already resident) block for the
        # inactive tail -> no DMA issued; the accumulate is pl.when-gated.
        return jnp.maximum(jnp.minimum(e, ne[0] - 1), 0)

    active_spec_kwargs = {}
    if active_buffers is not None:
        # Opt-in deeper buffering on the only per-step stream (costs VMEM).
        active_spec_kwargs["pipeline_mode"] = pl.Buffered(n_buf)

    grid_spec = pltpu.PrefetchScalarGridSpec(
        num_scalar_prefetch=1,
        grid=(T // tt, E),
        in_specs=[
            # Hoisted expert scales: one (E, tt, 1) DMA per token tile (constant in e).
            pl.BlockSpec((E, tt, 1), lambda i, e, ne: (0, i, 0)),
            # Per-expert token slab: the only input whose block index changes per step.
            pl.BlockSpec((1, tt, H),
                         lambda i, e, ne: (_clamped_e(e, ne), i, 0),
                         **active_spec_kwargs),
            pl.BlockSpec((tt, H), lambda i, e, ne: (i, 0)),   # token_input
            pl.BlockSpec((tt, H), lambda i, e, ne: (i, 0)),   # residual
            pl.BlockSpec((1, H), lambda i, e, ne: (0, 0)),    # norm_weight
        ],
        out_specs=[
            pl.BlockSpec((tt, H), lambda i, e, ne: (i, 0)),   # hidden_states
            pl.BlockSpec((tt, H), lambda i, e, ne: (i, 0)),   # output_residual
        ],
        scratch_shapes=[pltpu.VMEM((tt, H), jnp.float32)],
    )

    hidden, resid_out = pl.pallas_call(
        kernel,
        grid_spec=grid_spec,
        out_shape=(
            jax.ShapeDtypeStruct((T, H), out_dtype),
            jax.ShapeDtypeStruct((T, H), out_dtype),
        ),
        compiler_params=pltpu.CompilerParams(
            dimension_semantics=("parallel", "arbitrary"),
            vmem_limit_bytes=vmem_limit_bytes),
    )(n_exp, scale3, active_experts_token_input, token_input, residual, nw2)
    return hidden, resid_out


def _reference(residual, norm_weight, device_num_experts, scale_input,
               active_experts_token_input, token_input, eps):
    E = active_experts_token_input.shape[0]
    mask = (jnp.arange(E) < device_num_experts).astype(jnp.float32)
    scale = scale_input * mask[:, None]
    expert_reduction = jnp.sum(
        active_experts_token_input * scale[..., None], axis=0)
    output_add = expert_reduction + token_input
    output_residual = output_add + residual
    var = jnp.mean(output_residual**2, axis=-1, keepdims=True)
    hidden = output_residual * lax.rsqrt(var + eps) * norm_weight[None, :]
    return hidden, output_residual


if __name__ == "__main__":
    E, T, H = 4, 16, 256          # small shapes: experts, tokens, hidden
    eps = 1e-5
    key = jax.random.PRNGKey(0)
    k1, k2, k3, k4, k5 = jax.random.split(key, 5)

    residual = jax.random.normal(k1, (T, H), dtype=jnp.float32)
    norm_weight = jax.random.normal(k2, (H,), dtype=jnp.float32) * 0.1 + 1.0
    scale_input = jax.random.uniform(k3, (E, T), dtype=jnp.float32)
    active_experts_token_input = jax.random.normal(k4, (E, T, H),
                                                   dtype=jnp.float32)
    token_input = jax.random.normal(k5, (T, H), dtype=jnp.float32)
    device_num_experts = jnp.array(3, dtype=jnp.int32)

    hidden, resid_out = moe_allreduce(
        residual, norm_weight, device_num_experts, scale_input,
        active_experts_token_input, token_input, eps)
    jax.block_until_ready((hidden, resid_out))

    ref_hidden, ref_resid = _reference(
        residual, norm_weight, device_num_experts, scale_input,
        active_experts_token_input, token_input, eps)

    assert jnp.allclose(hidden, ref_hidden, atol=1e-4, rtol=1e-4)
    assert jnp.allclose(resid_out, ref_resid, atol=1e-4, rtol=1e-4)
    print("KERNEL_OK")
</pallas_src>

<mosaic_0001>
module attributes {stable_mosaic.version = 11 : i64} {
  func.func @_moe_allreduce_kernel(%arg0: i32, %arg1: i32, %arg2: memref<1xi32, #tpu.memory_space<smem>>, %arg3: memref<4x8x1xf32, #tpu.memory_space<vmem>>, %arg4: memref<1x8x256xf32, #tpu.memory_space<vmem>>, %arg5: memref<8x256xf32, #tpu.memory_space<vmem>>, %arg6: memref<8x256xf32, #tpu.memory_space<vmem>>, %arg7: memref<1x256xf32, #tpu.memory_space<vmem>>, %arg8: memref<8x256xf32, #tpu.memory_space<vmem>>, %arg9: memref<8x256xf32, #tpu.memory_space<vmem>>, %arg10: memref<8x256xf32, #tpu.memory_space<vmem>>) attributes {dimension_semantics = [#tpu.dimension_semantics<parallel>, #tpu.dimension_semantics<arbitrary>], iteration_bounds = array<i64: 2, 4>, scalar_prefetch = 1 : i64, scratch_operands = 1 : i64, tpu.core_type = #tpu.core_type<tc>, window_params = [{transform_indices = @transform_0, window_bounds = array<i64: 4, 8, 1>}, {transform_indices = @transform_1, window_bounds = array<i64: 1, 8, 256>}, {transform_indices = @transform_2, window_bounds = array<i64: 8, 256>}, {transform_indices = @transform_3, window_bounds = array<i64: 8, 256>}, {pipeline_mode = #tpu.pipeline_mode<synchronous>, transform_indices = @transform_4, window_bounds = array<i64: 1, 256>}, {transform_indices = @transform_5, window_bounds = array<i64: 8, 256>}, {transform_indices = @transform_6, window_bounds = array<i64: 8, 256>}]} {
    %c0 = arith.constant 0 : index
    %0 = memref.load %arg2[%c0] : memref<1xi32, #tpu.memory_space<smem>>
    %c0_i32 = arith.constant 0 : i32
    %1 = arith.cmpi eq, %arg1, %c0_i32 : i32
    %2 = arith.extui %1 : i1 to i32
    %c0_i32_0 = arith.constant 0 : i32
    %3 = arith.cmpi ne, %2, %c0_i32_0 : i32
    scf.if %3 {
      %c0_3 = arith.constant 0 : index
      %c0_4 = arith.constant 0 : index
      %10 = vector.load %arg5[%c0_3, %c0_4] : memref<8x256xf32, #tpu.memory_space<vmem>>, vector<8x256xf32>
      %c0_5 = arith.constant 0 : index
      %c0_6 = arith.constant 0 : index
      %11 = vector.load %arg6[%c0_5, %c0_6] : memref<8x256xf32, #tpu.memory_space<vmem>>, vector<8x256xf32>
      %12 = arith.addf %10, %11 : vector<8x256xf32>
      %c0_7 = arith.constant 0 : index
      %c0_8 = arith.constant 0 : index
      %13 = vector.load %arg10[%c0_7, %c0_8] : memref<8x256xf32, #tpu.memory_space<vmem>>, vector<8x256xf32>
      tpu.vector_store %arg10[%c0_7, %c0_8], %12 {strides = array<i32>} : memref<8x256xf32, #tpu.memory_space<vmem>>, vector<8x256xf32>,
    } else {
    }
    %4 = arith.cmpi slt, %arg1, %0 : i32
    %5 = arith.extui %4 : i1 to i32
    %c0_i32_1 = arith.constant 0 : i32
    %6 = arith.cmpi ne, %5, %c0_i32_1 : i32
    scf.if %6 {
      %10 = arith.index_cast %arg1 : i32 to index
      %c0_3 = arith.constant 0 : index
      %c0_4 = arith.constant 0 : index
      %11 = vector.load %arg3[%10, %c0_3, %c0_4] : memref<4x8x1xf32, #tpu.memory_space<vmem>>, vector<1x8x1xf32>
      %12 = vector.shape_cast %11 : vector<1x8x1xf32> to vector<8x1xf32>
      %c0_5 = arith.constant 0 : index
      %c0_6 = arith.constant 0 : index
      %13 = vector.load %arg10[%c0_5, %c0_6] : memref<8x256xf32, #tpu.memory_space<vmem>>, vector<8x256xf32>
      %c0_7 = arith.constant 0 : index
      %c0_8 = arith.constant 0 : index
      %c0_9 = arith.constant 0 : index
      %14 = vector.load %arg4[%c0_7, %c0_8, %c0_9] : memref<1x8x256xf32, #tpu.memory_space<vmem>>, vector<1x8x256xf32>
      %15 = vector.shape_cast %14 : vector<1x8x256xf32> to vector<8x256xf32>
      %16 = vector.broadcast %12 : vector<8x1xf32> to vector<8x256xf32>
      %17 = arith.mulf %15, %16 : vector<8x256xf32>
      %18 = arith.addf %13, %17 : vector<8x256xf32>
      %c0_10 = arith.constant 0 : index
      %c0_11 = arith.constant 0 : index
      %19 = vector.load %arg10[%c0_10, %c0_11] : memref<8x256xf32, #tpu.memory_space<vmem>>, vector<8x256xf32>
      tpu.vector_store %arg10[%c0_10, %c0_11], %18 {strides = array<i32>} : memref<8x256xf32, #tpu.memory_space<vmem>>, vector<8x256xf32>,
    } else {
    }
    %c3_i32 = arith.constant 3 : i32
    %7 = arith.cmpi eq, %arg1, %c3_i32 : i32
    %8 = arith.extui %7 : i1 to i32
    %c0_i32_2 = arith.constant 0 : i32
    %9 = arith.cmpi ne, %8, %c0_i32_2 : i32
    scf.if %9 {
      %c0_3 = arith.constant 0 : index
      %c0_4 = arith.constant 0 : index
      %10 = vector.load %arg10[%c0_3, %c0_4] : memref<8x256xf32, #tpu.memory_space<vmem>>, vector<8x256xf32>
      %11 = arith.mulf %10, %10 : vector<8x256xf32>
      %cst = arith.constant dense<0.000000e+00> : vector<8xf32>
      %12 = vector.multi_reduction <add>, %11, %cst [1] : vector<8x256xf32> to vector<8xf32>
      %13 = vector.shape_cast %12 : vector<8xf32> to vector<8x1xf32>
      %cst_5 = arith.constant 2.560000e+02 : f32
      %14 = vector.broadcast %cst_5 : f32 to vector<8x1xf32>
      %15 = arith.divf %13, %14 : vector<8x1xf32>
      %cst_6 = arith.constant 9.99999974E-6 : f32
      %16 = vector.broadcast %cst_6 : f32 to vector<8x1xf32>
      %17 = arith.addf %15, %16 : vector<8x1xf32>
      %18 = math.rsqrt %17 : vector<8x1xf32>
      %19 = vector.broadcast %18 : vector<8x1xf32> to vector<8x256xf32>
      %20 = arith.mulf %10, %19 : vector<8x256xf32>
      %c0_7 = arith.constant 0 : index
      %c0_8 = arith.constant 0 : index
      %21 = vector.load %arg7[%c0_7, %c0_8] : memref<1x256xf32, #tpu.memory_space<vmem>>, vector<1x256xf32>
      %22 = vector.broadcast %21 : vector<1x256xf32> to vector<8x256xf32>
      %23 = arith.mulf %20, %22 : vector<8x256xf32>
      %c0_9 = arith.constant 0 : index
      %c0_10 = arith.constant 0 : index
      %24 = vector.load %arg8[%c0_9, %c0_10] : memref<8x256xf32, #tpu.memory_space<vmem>>, vector<8x256xf32>
      tpu.vector_store %arg8[%c0_9, %c0_10], %23 {strides = array<i32>} : memref<8x256xf32, #tpu.memory_space<vmem>>, vector<8x256xf32>,
      %c0_11 = arith.constant 0 : index
      %c0_12 = arith.constant 0 : index
      %25 = vector.load %arg9[%c0_11, %c0_12] : memref<8x256xf32, #tpu.memory_space<vmem>>, vector<8x256xf32>
      tpu.vector_store %arg9[%c0_11, %c0_12], %10 {strides = array<i32>} : memref<8x256xf32, #tpu.memory_space<vmem>>, vector<8x256xf32>,
    } else {
    }
    return
  }
  func.func @transform_0(%arg0: i32, %arg1: i32, %arg2: memref<1xi32, #tpu.memory_space<smem>>) -> (i32, i32, i32) {
    %c0_i32 = arith.constant 0 : i32
    %c0_i32_0 = arith.constant 0 : i32
    %c0_i32_1 = arith.constant 0 : i32
    return %c0_i32, %arg0, %c0_i32_0 : i32, i32, i32
  }
  func.func @transform_1(%arg0: i32, %arg1: i32, %arg2: memref<1xi32, #tpu.memory_space<smem>>) -> (i32, i32, i32) {
    %c0 = arith.constant 0 : index
    %0 = memref.load %arg2[%c0] : memref<1xi32, #tpu.memory_space<smem>>
    %c1_i32 = arith.constant 1 : i32
    %1 = arith.subi %0, %c1_i32 : i32
    %2 = arith.minsi %arg1, %1 : i32
    %c0_i32 = arith.constant 0 : i32
    %3 = arith.maxsi %2, %c0_i32 : i32
    %c0_i32_0 = arith.constant 0 : i32
    %c0_i32_1 = arith.constant 0 : i32
    return %3, %arg0, %c0_i32_0 : i32, i32, i32
  }
  func.func @transform_2(%arg0: i32, %arg1: i32, %arg2: memref<1xi32, #tpu.memory_space<smem>>) -> (i32, i32) {
    %c0_i32 = arith.constant 0 : i32
    %c0_i32_0 = arith.constant 0 : i32
    return %arg0, %c0_i32 : i32, i32
  }
  func.func @transform_3(%arg0: i32, %arg1: i32, %arg2: memref<1xi32, #tpu.memory_space<smem>>) -> (i32, i32) {
    %c0_i32 = arith.constant 0 : i32
    %c0_i32_0 = arith.constant 0 : i32
    return %arg0, %c0_i32 : i32, i32
  }
  func.func @transform_4(%arg0: i32, %arg1: i32, %arg2: memref<1xi32, #tpu.memory_space<smem>>) -> (i32, i32) {
    %c0_i32 = arith.constant 0 : i32
    %c0_i32_0 = arith.constant 0 : i32
    %c0_i32_1 = arith.constant 0 : i32
    return %c0_i32, %c0_i32_0 : i32, i32
  }
  func.func @transform_5(%arg0: i32, %arg1: i32, %arg2: memref<1xi32, #tpu.memory_space<smem>>) -> (i32, i32) {
    %c0_i32 = arith.constant 0 : i32
    %c0_i32_0 = arith.constant 0 : i32
    return %arg0, %c0_i32 : i32, i32
  }
  func.func @transform_6(%arg0: i32, %arg1: i32, %arg2: memref<1xi32, #tpu.memory_space<smem>>) -> (i32, i32) {
    %c0_i32 = arith.constant 0 : i32
    %c0_i32_0 = arith.constant 0 : i32
    return %arg0, %c0_i32 : i32, i32
  }
}

</mosaic_0001>

<bundles_post_ra>
// kernel: tpu_custom_call.1
= control target key start
LH: loop header
LB: loop body
LE: loop exit
PB: predicated region body
PF: predicated region fallthrough
CT: control target
= control target key end

     0   :  { %s1352_s0 = inlined_call_operand.<no memory space> [shape: s32[1], index: 0, kind: input, shape index: {}]   ;;  %s1353_s1 = inlined_call_operand.vmem [shape: f32[4,16,1], index: 1, kind: input, shape index: {}]   ;;  %s1354_s2 = inlined_call_operand.hbm [shape: f32[4,16,256], index: 2, kind: input, shape index: {}]   ;;  %s1355_s3 = inlined_call_operand.vmem [shape: f32[16,256], index: 3, kind: input, shape index: {}]   ;;  %s1356_s4 = inlined_call_operand.vmem [shape: f32[16,256], index: 4, kind: input, shape index: {}]   ;;  %s1357_s5 = inlined_call_operand.vmem [shape: f32[1,256], index: 5, kind: input, shape index: {}]   ;;  %s1358_s6 = inlined_call_operand.hbm [shape: f32[16,256], index: 6, kind: output, shape index: {0}]   ;;  %s1359_s7 = inlined_call_operand.hbm [shape: f32[16,256], index: 7, kind: output, shape index: {1}]  }
   0x1   :  { %1368 = sst [smem:[#allocation23_spill]] %s1353_s1 }
   0x2   :  { %1369 = sst [smem:[#allocation24_spill]] %s1359_s7 }
   0x3   :  { %13 = sst [smem:[#allocation4]] %s1352_s0 }
   0x4   :  { %14 = vsyncpa [#allocation7], 0 }
   0x5   :  { %16 = vsyncpa [#allocation7 + $0x1], 0 }
   0x6   :  { %17 = vsyncpa [#allocation8], 0 }
   0x7   :  { %19 = vsyncpa [#allocation8 + $0x1], 0 }
   0x8   :  { %20 = vsyncpa [#allocation11], 0 }
   0x9   :  { %22 = vsyncpa [#allocation11 + $0x1], 0  ;;  %s1066_s26 = smov 0   ;;  %s1068_s27 = smov 0  }
   0xa   :  { %s1070_s28 = smov 0   ;;  %s1072_s29 = smov 0  }
   0xb   :  { %s1074_s30 = smov 0   ;;  %s1076_s8 = smov 0  }
   0xc   :  { %s1078_s9 = smov 0   ;;  %s1080_s0 = smov 0  }
   0xd   :  { %s1082_s10 = smov 0   ;;  %s1084_s11 = smov 0  }
   0xe   :  { %s1086_s12 = smov 0  }
   0xf LB: > { %1370 = sst [smem:[#allocation15_spill]] %s977_s26  ;;  %s691_s13 = sadd.s32 4294967295, %s1017_s12   ;;  %s1017_s12 = sphi %s1086_s12, %s28_s12   ;;  %s1013_s11 = sphi %s1084_s11, %s1403_s11   ;;  %s1009_s10 = sphi %s1082_s10, %s1402_s10   ;;  %s1005_s0 = sphi %s1080_s0, %s1401_s0   ;;  %s1001_s9 = sphi %s1078_s9, %s1400_s9   ;;  %s997_s8 = sphi %s1076_s8, %s1393_s8   ;;  %s993_s30 = sphi %s1074_s30, %s1399_s30   ;;  %s989_s29 = sphi %s1072_s29, %s1391_s29   ;;  %s985_s28 = sphi %s1070_s28, %s1398_s28   ;;  %s981_s27 = sphi %s1068_s27, %s1397_s27   ;;  %s977_s26 = sphi %s1066_s26, %s1396_s26  }
  0x10   : > { %1371 = sst [smem:[#allocation16_spill]] %s989_s29  ;;  %s37_s15 = sadd.s32 1, %s1009_s10 }
  0x11   : > { %1372 = sst [smem:[#allocation17_spill]] %s997_s8  ;;  %p38_p0 = scmp.ge.s32.totalorder %s37_s15, 4 }
  0x12   : > { %s40_s16 = sadd.s32 1, %s1013_s11  ;;  %p54_p1 = scmp.ne.s32.totalorder %s997_s8, %s993_s30 }
  0x13   : > { %p55_p2 = scmp.eq.s32.totalorder %s1017_s12, 0  ;;  %s1405_s15 = smov (%p38_p0, %s37_s15), 0 }
  0x14   : > { %1373 = sst [smem:[#allocation18_spill]] %s1405_s15  ;;  %s1407_s16 = smov (!%p38_p0, %s40_s16), %s1013_s11 }
  0x15   : > { %p1134_p3 = por %p55_p2, %p54_p1  ;;  %s70_s18 = sld [smem:[#allocation4]] }
  0x16   : > { %p42_p4 = scmp.ge.s32.totalorder %s1407_s16, 2  ;;  %s47_s19 = sadd.s32 1, %s997_s8 }
  0x17   : > { %p94_p5 = scmp.ne.s32.totalorder %s989_s29, %s985_s28  ;;  %p100_p6 = scmp.ne.s32.totalorder %s985_s28, %s981_s27 }
  0x18   : > { %s1409_s16 = smov (%p42_p4, %s1407_s16), 0  ;;  %p101_p8 = scmp.eq.s32.totalorder %s691_s13, 0 }
  0x19   : > { %1375 = sst [smem:[#allocation19_spill]] %s1409_s16  ;;  %p1145_p7 = por %p94_p5, %p55_p2 }
  0x1a   : > { %s44_s21 = ssub.s32 %s1013_s11, %s1409_s16  ;;  %p197_p9 = scmp.eq.s32.totalorder %s691_s13, 7 }
  0x1b   : > { %p45_p10 = scmp.eq.s32.totalorder %s44_s21, 0  ;;  %s693_s22 = sadd.s32 4294967295, %s70_s18 }
  0x1c   : > { %p72_p11 = scmp.lt.s32.totalorder %s1009_s10, %s693_s22  ;;  %p78_p12 = scmp.lt.s32.totalorder %s1405_s15, %s693_s22 }
  0x1d   : > { %s1154_s23 = scalar_select %p45_p10, %s997_s8, %s47_s19  }
  0x1e   : > { %s73_s24 = scalar_select %p72_p11, %s1009_s10, %s693_s22 }
  0x1f   : > { %1377 = sst [smem:[#allocation20_spill]] %s1154_s23  ;;  %p1161_p0 = por %p101_p8, %p100_p6 }
  0x20   : > { %s79_s25 = scalar_select %p78_p12, %s1405_s15, %s693_s22 }
  0x21   : > { %p74_p13 = scmp.gt.s32.totalorder %s73_s24, 0  ;;  %p1168_p4 = por %p197_p9, %p54_p1 }
  0x22   : > { %p80_p2 = scmp.gt.s32.totalorder %s79_s25, 0  ;;  %p202_p5 = scmp.ne.s32.totalorder %s993_s30, %s977_s26 }
  0x23   : > { %s1379_s13 = scalar_select %p1168_p4, 1, 0 }
  0x24   : > { %s1411_s24 = smov (!%p74_p13, %s73_s24), 0  ;;  %s1413_s25 = smov (!%p80_p2, %s79_s25), 0 }
  0x25   : > { %s1380_s18 = sadd.s32 4294967294, %s1017_s12   ;;  %s82_s19 = ssub.s32 %s1411_s24, %s1413_s25 }
  0x26   : > { %p203_p10 = scmp.eq.s32.totalorder %s1380_s18, 7  ;;  %s87_s16 = sadd.s32 1, %s989_s29 }
  0x27   : > { %s84_s22 = sor.u32 %s82_s19, %s44_s21  ;;  %p696_p1 = scmp.ge.s32.totalorder %s1017_s12, 8 }
  0x28   : > { %p1177_p11 = por %p203_p10, %p202_p5  ;;  %p85_p6 = scmp.eq.s32.totalorder %s84_s22, 0 }
  0x29   : > { %248 = sbr.rel (%p696_p1) target bundleno = 99 (0x63), region = 20 }
  0x2a   : > { %s1381_s27 = scalar_select %p1177_p11, 1, 0 }
  0x2b   : > { %s1182_s15 = scalar_select %p85_p6, %s989_s29, %s87_s16  }
  0x2c   : > { %1382 = sst [smem:[#allocation21_spill]] %s1381_s27 }
  0x2d   : > { %1383 = sst [smem:[#allocation22_spill]] %s1182_s15 }
  0x30   : > { %251 = sbr.rel (!%p1134_p3) target bundleno = 60 (0x3c), region = 24  ;;  %s253_s23 = sand.u32 (%p1134_p3), 1, %s997_s8  }
  0x31   : > { %s698_s18 = sshll.u32 (%p1134_p3), %s1013_s11, 3  ;;  %s697_s24 = sshll.u32 (%p1134_p3), %s253_s23, 5 }
  0x32   : > { %s1384_s1 = sld [smem:[#allocation23_spill]] (%p1134_p3)  ;;  %s255_s16 = scalar_lea.vmem (%p1134_p3), [#allocation5], %s697_s24 }
  0x38   : > { %s257_s19 = scalar_lea.vmem %s1384_s1, %s698_s18 }
  0x39   : > { %v291_v0 = vld [vmem:[%s257_s19] sm:$0xff]  ;;  %v293_v1 = vld [vmem:[%s257_s19 + $0x10] sm:$0xff] }
  0x3a   : > { %v295_v2 = vld [vmem:[%s257_s19 + $0x20] sm:$0xff]  ;;  %292 = vst [vmem:[%s255_s16] sm:$0xff] %v291_v0  ;;  %294 = vst [vmem:[%s255_s16 + $0x8] sm:$0xff] %v293_v1  ;;  %v297_v3 = vld [vmem:[%s257_s19 + $0x30] sm:$0xff] }
  0x3b   : > { %296 = vst [vmem:[%s255_s16 + $0x10] sm:$0xff] %v295_v2  ;;  %298 = vst [vmem:[%s255_s16 + $0x18] sm:$0xff] %v297_v3 }
  0x3c PF: > { %s310_s17 = sld [smem:[#allocation4]]  ;;  %s305_s23 = sand.u32 1, %s989_s29  }
  0x3d   : > { %s699_s22 = sshll.u32 %s305_s23, 4  ;;  %s701_s25 = sshll.u32 %s1013_s11, 1 }
  0x3e   : > { %s309_s24 = scalar_lea.vmem [#allocation6], %s699_s22  ;;  %s306_s29 = scalar_lea.sflag [#allocation7], %s305_s23 }
  0x3f   : > { %s325_s21 = sshll.u32 %s309_s24, 4  ;;  %s839_s22 = scalar_lea.hbm %s1354_s2, 2048  ;;  %s1196_s21 = int_to_ptr.vmem [resolvable:$true] %s325_s21 }
  0x42   : > { %s700_s8 = sadd.s32 4294967295, %s310_s17 }
  0x43   : > { %p312_p3 = scmp.lt.s32.totalorder %s1009_s10, %s700_s8 }
  0x45   : > { %s313_s18 = scalar_select %p312_p3, %s1009_s10, %s700_s8 }
  0x47   : > { %p314_p8 = scmp.gt.s32.totalorder %s313_s18, 0 }
  0x49   : > { %s1415_s18 = smov (!%p314_p8, %s313_s18), 0 }
  0x4a   : > { %s702_s1 = sshll.u32 %s1415_s18, 2 }
  0x4b   : > { %s321_s19 = sadd.s32 %s702_s1, %s701_s25 }
  0x4c   : > { %s703_s16 = sshll.u32 %s321_s19, 7 }
  0x4d   : > { %s323_s26 = scalar_lea.hbm %s1354_s2, %s703_s16 }
  0x4e   : > { %s835_s7 = scalar_lea.hbm %s323_s26, 256  ;;  %p840_p2 = scmp.lt.u32.totalorder %s323_s26, %s1354_s2 }
  0x4f   : > { %p836_p9 = scmp.ne.s32.totalorder %s323_s26, %s835_s7  ;;  %p841_p5 = scmp.lt.u32.totalorder %s839_s22, %s835_s7 }
  0x50   : > { %p843_p6 = scmp.lt.u32.totalorder %s835_s7, %s323_s26 }
  0x51   : > { %p837_p12 = pnand %p836_p9, %p1145_p7  ;;  %p842_p10 = por %p841_p5, %p840_p2 }
  0x53   : > { %p838_p13 = pneg %p837_p12  ;;  %p844_p1 = por %p843_p6, %p842_p10 }
  0x55   : > { %p845_p3 = pnand %p844_p1, %p838_p13 }
  0x57   : > { %848 = shalt.err (!%p845_p3)
}
  0x58   : > { %s849_s1 = scalar_lea.vmem %s1196_s21, 256  ;;  %s1019_s15 = smov [#allocation6]  }
  0x59   : > { %p850_p8 = scmp.ne.s32.totalorder %s1196_s21, %s849_s1  ;;  %s853_s27 = sshll.u32 %s1019_s15, 4  ;;  %s854_s27 = int_to_ptr.vmem [resolvable:$false] %s853_s27 }
  0x5a   : > { %s855_s23 = scalar_lea.vmem %s854_s27, 512  ;;  %p856_p11 = scmp.lt.s32.totalorder %s1196_s21, %s854_s27 }
  0x5b   : > { %p851_p9 = pnand %p850_p8, %p1145_p7  ;;  %p857_p4 = scmp.lt.s32.totalorder %s855_s23, %s849_s1 }
  0x5d   : > { %p852_p12 = pneg %p851_p9  ;;  %p858_p2 = por %p857_p4, %p856_p11 }
  0x5f   : > { %p859_p5 = pnand %p858_p2, %p852_p12 }
  0x61   : > { %862 = shalt.err (!%p859_p5)
}
  0x62   : > { %729 = dma.hbm_to_vmem [thread:$0]  (%p1145_p7), %s323_s26, 256, %s1196_s21, %s306_s29  }
  0x63 PF: > { %p704_p13 = scmp.ge.s32.totalorder %s1017_s12, 1  ;;  %p346_p10 = scmp.lt.s32.totalorder %s1017_s12, 9 }
  0x65   : > { %p347_p6 = pnand %p704_p13, %p346_p10 }
  0x66   : > { %s1220_s7 = sand.u32 (!%p347_p6), 1, %s993_s30   ;;  %s359_s25 = sand.u32 (!%p347_p6), 1, %s985_s28  }
  0x67   : > { %350 = sbr.rel (%p347_p6) target bundleno = 483 (0x1e3), region = 74  ;;  %s705_s19 = sshll.u32 (!%p347_p6), %s1220_s7, 5 }
  0x68   : > { %s1224_s16 = sshll.u32 (!%p347_p6), %s359_s25, 4  ;;  %s1226_s20 = scalar_lea.vmem (!%p347_p6), [#allocation5], %s705_s19 }
  0x69   : > { %s360_s26 = scalar_lea.sflag (!%p347_p6), [#allocation7], %s359_s25  ;;  %s363_s29 = scalar_lea.vmem (!%p347_p6), [#allocation6], %s1224_s16 }
  0x6e   : > { %964 = dma.done.wait (%p1161_p0), %s360_s26, 256  }
  0x6f   : > { %966 = vsyncadd (%p1161_p0), %s360_s26, 4294967040  ;;  %s707_s21 = sshll.u32 %s1220_s7, 4  ;;  %p417_p7 = scmp.lt.s32.totalorder %s1005_s0, 1 }
  0x70   : > { %s427_s8 = sld [smem:[#allocation4]]  ;;  %s1242_s25 = scalar_lea.vmem [#allocation9], %s707_s21 }
  0x71   : > { %s418_s17 = scalar_select %p417_p7, %s1005_s0, 1 }
  0x72   : > { %s1244_s14 = scalar_lea.vmem [#allocation10], %s707_s21  ;;  %p713_p0 = scmp.ne.s32.totalorder %s1001_s9, 0 }
  0x73   : > { %s725_s22 = sshll.u32 %s418_s17, 4 }
  0x74   : > { %s421_s1 = scalar_lea.vmem %s1355_s3, %s725_s22  ;;  %s426_s23 = scalar_lea.vmem %s1356_s4, %s725_s22 }
  0x75   : > { %431 = sbr.rel (%p713_p0) target bundleno = 124 (0x7c), region = 86  ;;  %v432_v4 = vld [vmem:[%s421_s1] sm:$0xff] (!%p713_p0)  ;;  %v433_v6 = vld [vmem:[%s421_s1 + $0x8] sm:$0xff] (!%p713_p0) }
  0x76   : > { %v434_v5 = vld [vmem:[%s426_s23] sm:$0xff] (!%p713_p0)  ;;  %v435_v8 = vld [vmem:[%s426_s23 + $0x8] sm:$0xff] (!%p713_p0) }
  0x77   : > { %v436_v7 = vadd.f32 (!%p713_p0), %v434_v5, %v432_v4  ;;  %v437_v9 = vadd.f32 (!%p713_p0), %v435_v8, %v433_v6 }
  0x79   : > { %438 = vst [vmem:[#allocation2] sm:$0xff] (!%p713_p0), %v436_v7  ;;  %439 = vst [vmem:[#allocation2 + $0x8] sm:$0xff] (!%p713_p0), %v437_v9 }
  0x7c PF: > { %p714_p4 = scmp.ge.s32.totalorder %s1001_s9, %s427_s8 }
  0x7d   : > { %s715_s19 = sshll.u32 (!%p714_p4), %s1001_s9, 3  ;;  %v1020_v10 = vmov (!%p714_p4), 0   ;;  %v449_v12 = vld [vmem:[%s363_s29] sm:$0xff] (!%p714_p4)  ;;  %v450_v13 = vld [vmem:[%s363_s29 + $0x8] sm:$0xff] (!%p714_p4) }
  0x7e   : > { %443 = sbr.rel (%p714_p4) target bundleno = 261 (0x105), region = 90  ;;  %832 = vset.pattern.permute.xlu0 (!%p714_p4), %v1020_v10  ;;  %s445_s26 = scalar_lea.vmem (!%p714_p4), %s1226_s20, %s715_s19 [#allocation5] }
  0x7f   : > { %v446_v11 = vld [vmem:[%s445_s26] sm:$0xff] (!%p714_p4) }
  0x80   : > { %453 = vperm.xlu0 (!%p714_p4), %832, %v446_v11   ;;  %v447_v14 = vld [vmem:[#allocation2] sm:$0xff] (!%p714_p4)  ;;  %v448_v15 = vld [vmem:[#allocation2 + $0x8] sm:$0xff] (!%p714_p4) }
  0xff   : > { %v454_v16 = vpop.permute.xlu0 %453 }
 0x100   : > { %v456_v17 = vmul.f32 %v454_v16, %v449_v12  ;;  %v457_v18 = vmul.f32 %v454_v16, %v450_v13 }
 0x102   : > { %v458_v19 = vadd.f32 %v456_v17, %v447_v14  ;;  %v459_v20 = vadd.f32 %v457_v18, %v448_v15 }
 0x104   : > { %460 = vst [vmem:[#allocation2] sm:$0xff] %v458_v19  ;;  %461 = vst [vmem:[#allocation2 + $0x8] sm:$0xff] %v459_v20 }
 0x105 PF: > { %p716_p11 = scmp.ne.s32.totalorder %s1001_s9, 3 }
 0x106   : > { %v481_v28 = vlaneseq (!%p716_p11)  ;;  %v479_v33 = vld [vmem:[%s1357_s5] sm:$0x3] (!%p716_p11) }
 0x107   : > { %465 = sbr.rel (%p716_p11) target bundleno = 434 (0x1b2), region = 94 }
 0x108   : > { %v482_v30 = vshrl.u32 (!%p716_p11), %v481_v28, 7 }
 0x10a   : > { %v483_v31 = vsub.s32 (!%p716_p11), 0, %v482_v30  ;;  %v487_v32 = vsub.s32 (!%p716_p11), 1, %v482_v30 }
 0x10b   : > { %v466_v21 = vld [vmem:[#allocation2] sm:$0xff] (!%p716_p11)  ;;  %v467_v22 = vld [vmem:[#allocation2 + $0x8] sm:$0xff] (!%p716_p11) }
 0x10c   : > { %v468_v23 = vmul.f32 (!%p716_p11), %v466_v21, %v466_v21  ;;  %v469_v24 = vmul.f32 (!%p716_p11), %v467_v22, %v467_v22  ;;  %495 = vst [vmem:[%s1244_s14] sm:$0xff] (!%p716_p11), %v466_v21  ;;  %496 = vst [vmem:[%s1244_s14 + $0x8] sm:$0xff] (!%p716_p11), %v467_v22  ;;  %v484_v34 = vrot.slane (!%p716_p11), %v479_v33, %v483_v31 }
 0x10d   : > { %v488_v35 = vrot.slane (!%p716_p11), %v479_v33, %v487_v32 }
 0x10e   : > { %v470_v25 = vadd.f32 %v469_v24, %v468_v23 }
 0x110   : > { %471 = vadd.xlane.f32.xlu0 %v470_v25 }
 0x19d   : > { %v472_v26 = vpop.xlane.xlu0 %471 }
 0x19e   : > { %v474_v27 = vmul.f32 0.00390625, %v472_v26 }
 0x1a0   : > { %v475_v29 = vadd.f32 1e-05, %v474_v27 }
 0x1a2   : > { %833 = vrsqrt.f32 %v475_v29 }
 0x1ac   : > { %v834_v36 = vpop.eup %833 }
 0x1ad   : > { %v477_v37 = vmul.f32 %v834_v36, %v466_v21  ;;  %v478_v38 = vmul.f32 %v834_v36, %v467_v22 }
 0x1af   : > { %v491_v39 = vmul.f32 %v484_v34, %v477_v37  ;;  %v492_v40 = vmul.f32 %v488_v35, %v478_v38 }
 0x1b1   : > { %493 = vst [vmem:[%s1242_s25] sm:$0xff] %v491_v39  ;;  %494 = vst [vmem:[%s1242_s25 + $0x8] sm:$0xff] %v492_v40 }
 0x1b2 PF: > { %s727_s20 = sshll.u32 %s1005_s0, 8  ;;  %s517_s17 = sshll.u32 %s1242_s25, 4  ;;  %s518_s17 = int_to_ptr.vmem [resolvable:$true] %s517_s17 }
 0x1b3   : > { %s1268_s8 = scalar_lea.hbm %s1358_s6, %s727_s20  ;;  %s498_s22 = scalar_lea.sflag [#allocation8], %s1220_s7 }
 0x1b4   : > { %s863_s24 = scalar_lea.vmem %s518_s17, 256  ;;  %p1385_p3 = scmp.ne.s32.totalorder %s1379_s13, 0 }
 0x1b5   : > { %p864_p1 = scmp.ne.s32.totalorder %s518_s17, %s863_s24  ;;  %s1021_s18 = smov [#allocation9]  }
 0x1b6   : > { %s867_s1 = sshll.u32 %s1021_s18, 4  ;;  %s868_s1 = int_to_ptr.vmem [resolvable:$false] %s867_s1 }
 0x1b7   : > { %p865_p8 = pnand %p864_p1, %p1385_p3  ;;  %s869_s15 = scalar_lea.vmem %s868_s1, 512 }
 0x1b8   : > { %p870_p12 = scmp.lt.s32.totalorder %s518_s17, %s868_s1  ;;  %p871_p2 = scmp.lt.s32.totalorder %s869_s15, %s863_s24 }
 0x1b9   : > { %p866_p9 = pneg %p865_p8 }
 0x1ba   : > { %p872_p5 = por %p871_p2, %p870_p12 }
 0x1bc   : > { %p873_p13 = pnand %p872_p5, %p866_p9 }
 0x1be   : > { %876 = shalt.err (!%p873_p13)
}
 0x1bf   : > { %s877_s27 = scalar_lea.hbm %s1268_s8, 256  ;;  %s881_s19 = scalar_lea.hbm %s1358_s6, 512 }
 0x1c0   : > { %p878_p10 = scmp.ne.s32.totalorder %s1268_s8, %s877_s27  ;;  %p882_p0 = scmp.lt.u32.totalorder %s1268_s8, %s1358_s6 }
 0x1c1   : > { %p883_p4 = scmp.lt.u32.totalorder %s881_s19, %s877_s27  ;;  %p885_p1 = scmp.lt.u32.totalorder %s877_s27, %s1268_s8 }
 0x1c2   : > { %p879_p6 = pnand %p878_p10, %p1385_p3 }
 0x1c3   : > { %p884_p11 = por %p883_p4, %p882_p0 }
 0x1c4   : > { %p880_p7 = pneg %p879_p6 }
 0x1c5   : > { %p886_p8 = por %p885_p1, %p884_p11 }
 0x1c7   : > { %p887_p9 = pnand %p886_p8, %p880_p7 }
 0x1c9   : > { %890 = shalt.err (!%p887_p9)
}
 0x1ca   : > { %731 = dma.vmem_to_hbm [thread:$0]  (%p1385_p3), %s518_s17, 256, %s1268_s8, %s498_s22  }
 0x1cb   : > { %s1386_s21 = sld [smem:[#allocation24_spill]]  ;;  %s531_s18 = sshll.u32 %s1244_s14, 4  ;;  %s532_s18 = int_to_ptr.vmem [resolvable:$true] %s531_s18 }
 0x1cc   : > { %s503_s1 = scalar_lea.sflag [#allocation11], %s1220_s7  ;;  %s891_s15 = scalar_lea.vmem %s532_s18, 256 }
 0x1cd   : > { %p892_p12 = scmp.ne.s32.totalorder %s532_s18, %s891_s15  ;;  %s1022_s27 = smov [#allocation10]  }
 0x1ce   : > { %s895_s23 = sshll.u32 %s1022_s27, 4  ;;  %s896_s23 = int_to_ptr.vmem [resolvable:$false] %s895_s23 }
 0x1cf   : > { %p893_p2 = pnand %p892_p12, %p1385_p3  ;;  %s897_s25 = scalar_lea.vmem %s896_s23, 512 }
 0x1d0   : > { %p898_p13 = scmp.lt.s32.totalorder %s532_s18, %s896_s23  ;;  %p899_p10 = scmp.lt.s32.totalorder %s897_s25, %s891_s15 }
 0x1d1   : > { %s1294_s24 = scalar_lea.hbm %s1386_s21, %s727_s20  ;;  %p894_p5 = pneg %p893_p2 }
 0x1d2   : > { %p900_p6 = por %p899_p10, %p898_p13 }
 0x1d4   : > { %p901_p7 = pnand %p900_p6, %p894_p5 }
 0x1d6   : > { %904 = shalt.err (!%p901_p7)
}
 0x1d7   : > { %s905_s0 = scalar_lea.hbm %s1294_s24, 256  ;;  %s909_s20 = scalar_lea.hbm %s1386_s21, 512 }
 0x1d8   : > { %p906_p0 = scmp.ne.s32.totalorder %s1294_s24, %s905_s0  ;;  %p910_p1 = scmp.lt.u32.totalorder %s1294_s24, %s1386_s21 }
 0x1d9   : > { %p911_p8 = scmp.lt.u32.totalorder %s909_s20, %s905_s0  ;;  %p913_p12 = scmp.lt.u32.totalorder %s905_s0, %s1294_s24 }
 0x1da   : > { %p907_p4 = pnand %p906_p0, %p1385_p3 }
 0x1db   : > { %p912_p9 = por %p911_p8, %p910_p1 }
 0x1dc   : > { %p908_p11 = pneg %p907_p4 }
 0x1dd   : > { %p914_p2 = por %p913_p12, %p912_p9 }
 0x1df   : > { %p915_p5 = pnand %p914_p2, %p908_p11 }
 0x1e1   : > { %918 = shalt.err (!%p915_p5)
}
 0x1e2   : > { %732 = dma.vmem_to_hbm [thread:$0]  (%p1385_p3), %s532_s18, 256, %s1294_s24, %s503_s1  }
 0x1e3 PF: > { %s1387_s22 = sld [smem:[#allocation15_spill]]  ;;  %s1388_s19 = sld [smem:[#allocation21_spill]] }
 0x1e4   : > { %p742_p13 = scmp.ge.s32.totalorder %s1017_s12, 2 }
 0x1e9   : > { %s543_s26 = sand.u32 1, %s1387_s22   ;;  %p1389_p10 = scmp.ne.s32.totalorder %s1388_s19, 0 }
 0x1ea   : > { %s544_s9 = scalar_lea.sflag [#allocation8], %s543_s26 }
 0x1eb   : > { %p736_p6 = pnand %p742_p13, %p1389_p10 }
 0x1ed   : > { %968 = dma.done.wait (!%p736_p6), %s544_s9, 256  }
 0x1ee   : > { %970 = vsyncadd (!%p736_p6), %s544_s9, 4294967040  ;;  %s553_s16 = scalar_lea.sflag [#allocation11], %s543_s26 }
 0x1ef   : > { %972 = dma.done.wait (!%p736_p6), %s553_s16, 256  }
 0x1f0   : > { %974 = vsyncadd (!%p736_p6), %s553_s16, 4294967040  ;;  %s28_s12 = sadd.s32 1, %s1017_s12   ;;  %s1390_s13 = sld [smem:[#allocation16_spill]] }
 0x1f1   : > { %p25_p7 = scmp.ge.s32.totalorder %s28_s12, 10   ;;  %s1391_s29 = sld [smem:[#allocation22_spill]] }
 0x1f2   : > { %s1392_s24 = sld [smem:[#allocation17_spill]]  ;;  %s1393_s8 = sld [smem:[#allocation20_spill]] }
 0x1f3   : > { %s1394_s18 = sld [smem:[#allocation18_spill]]  ;;  %s1395_s1 = sld [smem:[#allocation19_spill]] }
 0x1f4   : > { %s1396_s26 = smov %s993_s30  ;;  %s1397_s27 = smov %s985_s28 }
 0x1f5   : > { %s1400_s9 = smov %s1009_s10  ;;  %s1401_s0 = smov %s1013_s11 }
 0x1f6   : > { %s1398_s28 = smov %s1390_s13  ;;  %27 = sbr.rel (!%p25_p7) target bundleno = 15 (0xf), region = 167 }
 0x1f8   : > { %s1399_s30 = smov %s1392_s24 }
 0x1f9   : > { %s1402_s10 = smov %s1394_s18  ;;  %s1403_s11 = smov %s1395_s1 }
 0x1fd   :  { %558 = vsyncpa [#allocation7], 1 }
 0x1fe   :  { %560 = vsyncpa [#allocation7 + $0x1], 1 }
 0x1ff   :  { %561 = vsyncpa [#allocation8], 1 }
 0x200   :  { %563 = vsyncpa [#allocation8 + $0x1], 1 }
 0x201   :  { %564 = vsyncpa [#allocation11], 1 }
 0x202   :  { %566 = vsyncpa [#allocation11 + $0x1], 1 }

</bundles_post_ra>
